<compile_context>
chip_gen: v6e
topology: v6e:2x2x1
jax: 0.10.0
libtpu: 0.0.40
codegen_flags: <defaults>
</compile_context>

<pallas_src>
import jax
import jax.numpy as jnp
from jax.experimental import pallas as pl
from jax.experimental.pallas import tpu as pltpu


def _round_up(x, m):
    return ((x + m - 1) // m) * m


def _vmem_capacity_bytes():
    try:
        return int(pltpu.get_tpu_info().vmem_capacity_bytes)
    except Exception:
        return 64 * 1024 * 1024  # conservative fallback (v7x-sized)


def _embed_kernel(p_ref, w_ref, shift_ref, o_ref):
    # p_ref:     (tm, Kp)  bf16 patch rows
    # w_ref:     (Kp, Np)  bf16 conv weight with BN scale folded in
    # shift_ref: (1,  Np)  f32  folded bias:  bias*scale + beta - mean*scale
    # o_ref:     (tm, Np)  bf16
    acc = jnp.dot(p_ref[...], w_ref[...], preferred_element_type=jnp.float32)
    o_ref[...] = (acc + shift_ref[...]).astype(o_ref.dtype)


def embedding_forward(x, weight, bias, gamma, beta, running_mean, running_var,
                      *, patch_size, stride, eps=1e-5, tm=1024,
                      compute_dtype=jnp.bfloat16, channels_last=False):
    """x: [B, C, H, W] NCHW. Returns [B, embed_dim, H//stride, W//stride]
    (or [B, Ho, Wo, embed_dim] if channels_last=True)."""
    B, C, H, W = x.shape
    E = weight.shape[0]
    ph = pw = patch_size
    assert stride == patch_size, "kernel assumes non-overlapping patches (stride == patch_size)"
    assert H % ph == 0 and W % pw == 0
    Ho, Wo = H // ph, W // pw

    # ---- glue: patchify NCHW -> [M, K]; K flattened as (C, ph, pw) to match OIHW weight.
    patches = x.reshape(B, C, Ho, ph, Wo, pw)
    patches = patches.transpose(0, 2, 4, 1, 3, 5)          # [B, Ho, Wo, C, ph, pw]
    patches = patches.reshape(B * Ho * Wo, C * ph * pw)    # [M, K]

    # ---- fold inference BatchNorm into the conv weight / bias (standard conv+BN fold).
    scale = gamma / jnp.sqrt(running_var + eps)                       # [E]
    w_fold = weight.reshape(E, C * ph * pw).T * scale[None, :]        # [K, E]
    shift = bias * scale + (beta - running_mean * scale)              # [E]

    M, K = patches.shape
    N = E
    cd = jnp.dtype(compute_dtype)

    # ---- lane padding to multiples of 128 (full-width vregs, unmasked stores).
    # Deliberately NOT 256: padded zeros would cost HBM bandwidth on a mem-bound kernel.
    Kp = _round_up(K, 128)
    Np = _round_up(N, 128)

    # ---- choose the M tile from the chip's VMEM budget (multiple of 16 for bf16 rows).
    vmem_cap = _vmem_capacity_bytes()
    vmem_budget = int(0.80 * vmem_cap)
    fixed_bytes = 2 * Kp * Np * cd.itemsize + 2 * Np * 4       # resident weight+shift (worst case dbl-buf)
    per_row = 2 * Kp * cd.itemsize + 2 * Np * cd.itemsize      # dbl-buffered patch + output tile rows
    tm_max = max((vmem_budget - fixed_bytes) // per_row, 16)
    tm_max = (tm_max // 16) * 16

    tm_req = _round_up(max(tm, 16), 16)
    tm_eff = min(tm_req, tm_max, _round_up(M, 16))

    # v7x megacore: ensure the parallel M axis has >= 2 blocks so both TCs get work.
    if _round_up(M, tm_eff) // tm_eff < 2 and M > 16:
        tm_eff = _round_up(pl.cdiv(M, 2), 16)

    Mp = _round_up(M, tm_eff)

    patches_p = jnp.pad(patches.astype(compute_dtype), ((0, Mp - M), (0, Kp - K)))
    w_p = jnp.pad(w_fold.astype(compute_dtype), ((0, Kp - K), (0, Np - N)))
    shift_p = jnp.pad(shift.astype(jnp.float32).reshape(1, N), ((0, 0), (0, Np - N)))

    grid = (Mp // tm_eff,)

    est_vmem = 2 * tm_eff * Kp * cd.itemsize + 2 * tm_eff * Np * cd.itemsize + fixed_bytes
    vmem_limit = int(min(int(0.85 * vmem_cap), max(2 * est_vmem, 32 * 1024 * 1024)))

    cost = pl.CostEstimate(
        flops=2 * Mp * Kp * Np,
        transcendentals=0,
        bytes_accessed=(Mp * Kp * cd.itemsize + Kp * Np * cd.itemsize
                        + Np * 4 + Mp * Np * cd.itemsize),
    )

    def build(single_buffer_resident):
        # Weight / shift never change block index -> request single buffering to save VMEM.
        extra = {"pipeline_mode": pl.Buffered(1)} if single_buffer_resident else {}
        return pl.pallas_call(
            _embed_kernel,
            out_shape=jax.ShapeDtypeStruct((Mp, Np), compute_dtype),
            grid=grid,
            in_specs=[
                pl.BlockSpec((tm_eff, Kp), lambda i: (i, 0)),        # patch rows: stream over M
                pl.BlockSpec((Kp, Np), lambda i: (0, 0), **extra),   # folded weight: resident
                pl.BlockSpec((1, Np), lambda i: (0, 0), **extra),    # folded shift: resident
            ],
            out_specs=pl.BlockSpec((tm_eff, Np), lambda i: (i, 0)),
            compiler_params=pltpu.CompilerParams(
                dimension_semantics=("parallel",),
                vmem_limit_bytes=vmem_limit,
                allow_input_fusion=[True, False, False],  # fuse the patchify transpose/pad
            ),
            cost_estimate=cost,
        )

    try:
        out = build(True)(patches_p, w_p, shift_p)
    except Exception:
        # Fallback for builds where pipeline_mode=Buffered(1) is not supported.
        out = build(False)(patches_p, w_p, shift_p)

    # ---- glue: strip padding; optional NCHW transpose (module contract); cast to x.dtype.
    out = out[:M, :N].reshape(B, Ho, Wo, E)
    if not channels_last:
        out = out.transpose(0, 3, 1, 2)                   # [B, E, Ho, Wo]
    return out.astype(x.dtype)


def _reference(x, weight, bias, gamma, beta, running_mean, running_var,
               *, stride, eps=1e-5):
    y = jax.lax.conv_general_dilated(
        x, weight, window_strides=(stride, stride), padding="VALID",
        dimension_numbers=("NCHW", "OIHW", "NCHW"))
    y = y + bias[None, :, None, None]
    scale = gamma / jnp.sqrt(running_var + eps)
    shift = beta - running_mean * scale
    return y * scale[None, :, None, None] + shift[None, :, None, None]


if __name__ == "__main__":
    # small shapes consistent with the module's forward
    B, C, H, W = 2, 4, 16, 16
    patch_size = stride = 4
    embed_dim = 32

    key = jax.random.PRNGKey(0)
    kx, kw, kb, kg, kbe, km, kv = jax.random.split(key, 7)

    x = jax.random.normal(kx, (B, C, H, W), dtype=jnp.float32)
    weight = jax.random.normal(kw, (embed_dim, C, patch_size, patch_size), jnp.float32) * 0.1
    bias = jax.random.normal(kb, (embed_dim,), jnp.float32) * 0.1
    gamma = 1.0 + 0.1 * jax.random.normal(kg, (embed_dim,), jnp.float32)
    beta = 0.1 * jax.random.normal(kbe, (embed_dim,), jnp.float32)
    running_mean = 0.1 * jax.random.normal(km, (embed_dim,), jnp.float32)
    running_var = jax.random.uniform(kv, (embed_dim,), minval=0.5, maxval=1.5, dtype=jnp.float32)

    y = embedding_forward(x, weight, bias, gamma, beta, running_mean, running_var,
                          patch_size=patch_size, stride=stride)
    y = jax.block_until_ready(y)

    y_ref = _reference(x, weight, bias, gamma, beta, running_mean, running_var, stride=stride)
    assert y.shape == (B, embed_dim, H // stride, W // stride)
    # bf16 matmul inputs + bf16 kernel output (f32 accumulation) vs f32 reference
    max_err = float(jnp.max(jnp.abs(y - y_ref)))
    assert jnp.allclose(y, y_ref, atol=5e-2, rtol=5e-2), f"max abs err = {max_err}"

    print("KERNEL_OK")
</pallas_src>

<mosaic_0001>
module attributes {stable_mosaic.version = 11 : i64} {
  func.func @_embed_kernel(%arg0: i32, %arg1: memref<16x128xbf16, #tpu.memory_space<vmem>>, %arg2: memref<128x128xbf16, #tpu.memory_space<vmem>>, %arg3: memref<1x128xf32, #tpu.memory_space<vmem>>, %arg4: memref<16x128xbf16, #tpu.memory_space<vmem>>) attributes {dimension_semantics = [#tpu.dimension_semantics<parallel>], iteration_bounds = array<i64: 2>, scalar_prefetch = 0 : i64, scratch_operands = 0 : i64, tpu.core_type = #tpu.core_type<tc>, window_params = [{transform_indices = @transform_0, window_bounds = array<i64: 16, 128>}, {pipeline_mode = #tpu.pipeline_mode<synchronous>, transform_indices = @transform_1, window_bounds = array<i64: 128, 128>}, {pipeline_mode = #tpu.pipeline_mode<synchronous>, transform_indices = @transform_2, window_bounds = array<i64: 1, 128>}, {transform_indices = @transform_3, window_bounds = array<i64: 16, 128>}]} {
    %c0 = arith.constant 0 : index
    %c0_0 = arith.constant 0 : index
    %0 = vector.load %arg1[%c0, %c0_0] : memref<16x128xbf16, #tpu.memory_space<vmem>>, vector<16x128xbf16>
    %c0_1 = arith.constant 0 : index
    %c0_2 = arith.constant 0 : index
    %1 = vector.load %arg2[%c0_1, %c0_2] : memref<128x128xbf16, #tpu.memory_space<vmem>>, vector<128x128xbf16>
    %cst = arith.constant dense<0.000000e+00> : vector<16x128xf32>
    %2 = tpu.matmul %0, %1, %cst {dimension_numbers = #tpu.dot_dimension_numbers<[1], [0], [0], [1], [0, 0, 1, 1], [], []>} : vector<16x128xbf16>, vector<128x128xbf16>, vector<16x128xf32> -> vector<16x128xf32>
    %c0_3 = arith.constant 0 : index
    %c0_4 = arith.constant 0 : index
    %3 = vector.load %arg3[%c0_3, %c0_4] : memref<1x128xf32, #tpu.memory_space<vmem>>, vector<1x128xf32>
    %4 = vector.broadcast %3 : vector<1x128xf32> to vector<16x128xf32>
    %5 = arith.addf %2, %4 : vector<16x128xf32>
    %6 = arith.truncf %5 : vector<16x128xf32> to vector<16x128xbf16>
    %c0_5 = arith.constant 0 : index
    %c0_6 = arith.constant 0 : index
    %7 = vector.load %arg4[%c0_5, %c0_6] : memref<16x128xbf16, #tpu.memory_space<vmem>>, vector<16x128xbf16>
    tpu.vector_store %arg4[%c0_5, %c0_6], %6 {strides = array<i32>} : memref<16x128xbf16, #tpu.memory_space<vmem>>, vector<16x128xbf16>,
    return
  }
  func.func @transform_0(%arg0: i32) -> (i32, i32) {
    %c0_i32 = arith.constant 0 : i32
    %c0_i32_0 = arith.constant 0 : i32
    return %arg0, %c0_i32 : i32, i32
  }
  func.func @transform_1(%arg0: i32) -> (i32, i32) {
    %c0_i32 = arith.constant 0 : i32
    %c0_i32_0 = arith.constant 0 : i32
    %c0_i32_1 = arith.constant 0 : i32
    return %c0_i32, %c0_i32_0 : i32, i32
  }
  func.func @transform_2(%arg0: i32) -> (i32, i32) {
    %c0_i32 = arith.constant 0 : i32
    %c0_i32_0 = arith.constant 0 : i32
    %c0_i32_1 = arith.constant 0 : i32
    return %c0_i32, %c0_i32_0 : i32, i32
  }
  func.func @transform_3(%arg0: i32) -> (i32, i32) {
    %c0_i32 = arith.constant 0 : i32
    %c0_i32_0 = arith.constant 0 : i32
    return %arg0, %c0_i32 : i32, i32
  }
}

module attributes {stable_mosaic.version = 11 : i64} {
  func.func @_embed_kernel(%arg0: i32, %arg1: memref<16x128xbf16, #tpu.memory_space<vmem>>, %arg2: memref<128x128xbf16, #tpu.memory_space<vmem>>, %arg3: memref<1x128xf32, #tpu.memory_space<vmem>>, %arg4: memref<16x128xbf16, #tpu.memory_space<vmem>>) attributes {dimension_semantics = [#tpu.dimension_semantics<parallel>], iteration_bounds = array<i64: 2>, scalar_prefetch = 0 : i64, scratch_operands = 0 : i64, tpu.core_type = #tpu.core_type<tc>, window_params = [{transform_indices = @transform_0, window_bounds = array<i64: 16, 128>}, {pipeline_mode = #tpu.pipeline_mode<synchronous>, transform_indices = @transform_1, window_bounds = array<i64: 128, 128>}, {pipeline_mode = #tpu.pipeline_mode<synchronous>, transform_indices = @transform_2, window_bounds = array<i64: 1, 128>}, {transform_indices = @transform_3, window_bounds = array<i64: 16, 128>}]} {
    %c0 = arith.constant 0 : index
    %c0_0 = arith.constant 0 : index
    %0 = vector.load %arg1[%c0, %c0_0] : memref<16x128xbf16, #tpu.memory_space<vmem>>, vector<16x128xbf16>
    %c0_1 = arith.constant 0 : index
    %c0_2 = arith.constant 0 : index
    %1 = vector.load %arg2[%c0_1, %c0_2] : memref<128x128xbf16, #tpu.memory_space<vmem>>, vector<128x128xbf16>
    %cst = arith.constant dense<0.000000e+00> : vector<16x128xf32>
    %2 = tpu.matmul %0, %1, %cst {dimension_numbers = #tpu.dot_dimension_numbers<[1], [0], [0], [1], [0, 0, 1, 1], [], []>} : vector<16x128xbf16>, vector<128x128xbf16>, vector<16x128xf32> -> vector<16x128xf32>
    %c0_3 = arith.constant 0 : index
    %c0_4 = arith.constant 0 : index
    %3 = vector.load %arg3[%c0_3, %c0_4] : memref<1x128xf32, #tpu.memory_space<vmem>>, vector<1x128xf32>
    %4 = vector.broadcast %3 : vector<1x128xf32> to vector<16x128xf32>
    %5 = arith.addf %2, %4 : vector<16x128xf32>
    %6 = arith.truncf %5 : vector<16x128xf32> to vector<16x128xbf16>
    %c0_5 = arith.constant 0 : index
    %c0_6 = arith.constant 0 : index
    %7 = vector.load %arg4[%c0_5, %c0_6] : memref<16x128xbf16, #tpu.memory_space<vmem>>, vector<16x128xbf16>
    tpu.vector_store %arg4[%c0_5, %c0_6], %6 {strides = array<i32>} : memref<16x128xbf16, #tpu.memory_space<vmem>>, vector<16x128xbf16>,
    return
  }
  func.func @transform_0(%arg0: i32) -> (i32, i32) {
    %c0_i32 = arith.constant 0 : i32
    %c0_i32_0 = arith.constant 0 : i32
    return %arg0, %c0_i32 : i32, i32
  }
  func.func @transform_1(%arg0: i32) -> (i32, i32) {
    %c0_i32 = arith.constant 0 : i32
    %c0_i32_0 = arith.constant 0 : i32
    %c0_i32_1 = arith.constant 0 : i32
    return %c0_i32, %c0_i32_0 : i32, i32
  }
  func.func @transform_2(%arg0: i32) -> (i32, i32) {
    %c0_i32 = arith.constant 0 : i32
    %c0_i32_0 = arith.constant 0 : i32
    %c0_i32_1 = arith.constant 0 : i32
    return %c0_i32, %c0_i32_0 : i32, i32
  }
  func.func @transform_3(%arg0: i32) -> (i32, i32) {
    %c0_i32 = arith.constant 0 : i32
    %c0_i32_0 = arith.constant 0 : i32
    return %arg0, %c0_i32 : i32, i32
  }
}

</mosaic_0001>

<bundles_post_ra>
// kernel: tpu_custom_call.1
= control target key start
LH: loop header
LB: loop body
LE: loop exit
PB: predicated region body
PF: predicated region fallthrough
CT: control target
= control target key end

     0   :  { %8 = vsyncpa [#allocation3], 0  ;;  %s918_s0 = inlined_call_operand.hbm [shape: bf16[32,128], index: 0, kind: input, shape index: {}]   ;;  %s919_s1 = inlined_call_operand.hbm [shape: bf16[128,128], index: 1, kind: input, shape index: {}]   ;;  %s920_s2 = inlined_call_operand.vmem [shape: f32[1,128], index: 2, kind: input, shape index: {}]   ;;  %s921_s3 = inlined_call_operand.hbm [shape: bf16[32,128], index: 3, kind: output, shape index: {}]  }
   0x1   :  { %10 = vsyncpa [#allocation3 + $0x1], 0 }
   0x2   :  { %11 = vsyncpa [#allocation6], 0 }
   0x3   :  { %12 = vsyncpa [#allocation4], 0 }
   0x4   :  { %14 = vsyncpa [#allocation4 + $0x1], 0  ;;  %s725_s12 = smov 0   ;;  %s727_s13 = smov 0  }
   0x5   :  { %s729_s14 = smov 0   ;;  %s731_s15 = smov 0  }
   0x6 LB: > { %s746_s16 = sadd.s32 4294967295, %s694_s15   ;;  %s434_s17 = sadd.s32 4294967294, %s694_s15   ;;  %s694_s15 = sphi %s731_s15, %s943_s15   ;;  %s690_s14 = sphi %s729_s14, %s942_s14   ;;  %s686_s13 = sphi %s727_s13, %s941_s13   ;;  %s682_s12 = sphi %s725_s12, %s940_s12  }
   0x7   : > { %p40_p0 = scmp.ne.s32.totalorder %s686_s13, %s682_s12  ;;  %p922_p1 = scmp.eq.s32.totalorder %s746_s16, 0 }
   0x8   : > { %p112_p3 = scmp.eq.s32.totalorder %s434_s17, 1  ;;  %p435_p5 = scmp.ge.s32.totalorder %s694_s15, 1 }
   0x9   : > { %p755_p4 = por %p922_p1, %p40_p0  ;;  %p119_p7 = scmp.lt.s32.totalorder %s694_s15, 3 }
   0xa   : > { %p760_p6 = por %p112_p3, %p40_p0  ;;  %s696_s21 = smov [#allocation5]  }
   0xb   : > { %s926_s18 = scalar_select %p755_p4, 1, 0 }
   0xc   : > { %s927_s19 = scalar_select %p760_p6, 1, 0 }
   0xd   : > { %p765_p8 = pnand %p435_p5, %p119_p7  ;;  %s131_s22 = sshll.u32 %s696_s21, 4  ;;  %s132_s22 = int_to_ptr.vmem [resolvable:$true] %s131_s22 }
   0xe   : > { %s779_s24 = sadd.s32 1, %s694_s15   ;;  %s27_s25 = sadd.s32 1, %s690_s14 }
   0xf   : > { %s928_s20 = scalar_select %p765_p8, 1, 0 }
  0x10   : > { %p508_p9 = pneg %p765_p8  ;;  %s24_s26 = ssub.s32 %s694_s15, %s779_s24 }
  0x11   : > { %s583_s27 = scalar_lea.vmem %s132_s22, 1024  ;;  %p591_p5 = scmp.lt.s32.totalorder %s132_s22, %s132_s22 }
  0x12   : > { %p774_p11 = pnand %p508_p9, %p922_p1  ;;  %p584_p13 = scmp.ne.s32.totalorder %s132_s22, %s583_s27 }
  0x13   : > { %p592_p7 = scmp.lt.s32.totalorder %s583_s27, %s583_s27 }
  0x14   : > { %p574_p12 = pneg %p774_p11 }
  0x15   : > { %p593_p10 = por %p592_p7, %p591_p5 }
  0x16   : > { %p586_p0 = pnand %p584_p13, %p574_p12 }
  0x18   : > { %p587_p3 = pneg %p586_p0 }
  0x1a   : > { %p594_p2 = pnand %p593_p10, %p587_p3 }
  0x1c   : > { %597 = shalt.err (!%p594_p2)
}
  0x1d   : > { %s697_s28 = smov 64   ;;  %s698_s29 = smov 4  }
  0x1e   : > { %511 = dma.hbm_to_vmem [thread:$0]  (!%p774_p11), %s919_s1, 1024, %s132_s22, [#allocation6], %s697_s28, %s697_s28, %s698_s29  }
  0x1f   : > { %p25_p2 = scmp.eq.s32.totalorder %s24_s26, 0  ;;  %p34_p9 = scmp.ne.s32.totalorder %s690_s14, %s686_s13 }
  0x20   : > { %p35_p10 = scmp.eq.s32.totalorder %s694_s15, 0  ;;  %p521_p12 = scmp.lt.s32.totalorder %s694_s15, 2 }
  0x21   : > { %s799_s5 = scalar_select %p25_p2, %s690_s14, %s27_s25  }
  0x22   : > { %p36_p13 = por %p35_p10, %p34_p9  ;;  %p930_p0 = scmp.eq.s32.totalorder %s746_s16, 1 }
  0x23   : > { %s148_s7 = sand.u32 1, %s690_s14   ;;  %s462_s8 = sshll.u32 %s694_s15, 7 }
  0x24   : > { %p803_p3 = por %p930_p0, %p34_p9  ;;  %s438_s9 = sshll.u32 %s148_s7, 3 }
  0x25   : > { %s812_s17 = scalar_lea.hbm %s918_s0, %s462_s8  ;;  %s152_s21 = scalar_lea.vmem [#allocation2], %s438_s9 }
  0x26   : > { %s931_s6 = scalar_select %p803_p3, 1, 0 }
  0x27   : > { %s159_s22 = sshll.u32 %s152_s21, 4  ;;  %p814_p11 = pnand %p521_p12, %p36_p13  ;;  %s818_s22 = int_to_ptr.vmem [resolvable:$true] %s159_s22 }
  0x28   : > { %s820_s25 = scalar_lea.sflag [#allocation3], %s148_s7  ;;  %s598_s26 = scalar_lea.hbm %s812_s17, 128 }
  0x29   : > { %p599_p5 = scmp.ne.s32.totalorder %s812_s17, %s598_s26  ;;  %p600_p7 = pneg %p814_p11 }
  0x2a   : > { %s603_s4 = scalar_lea.hbm %s918_s0, 256  ;;  %p604_p10 = scmp.lt.s32.totalorder %s812_s17, %s918_s0 }
  0x2b   : > { %p601_p2 = pnand %p600_p7, %p599_p5  ;;  %p605_p12 = scmp.lt.s32.totalorder %s603_s4, %s598_s26 }
  0x2d   : > { %p602_p9 = pneg %p601_p2  ;;  %p606_p13 = por %p605_p12, %p604_p10 }
  0x2f   : > { %p607_p0 = pnand %p606_p13, %p602_p9 }
  0x31   : > { %610 = shalt.err (!%p607_p0)
}
  0x32   : > { %s611_s7 = scalar_lea.vmem %s818_s22, 128  ;;  %s699_s10 = smov [#allocation2]  }
  0x33   : > { %p612_p1 = scmp.ne.s32.totalorder %s818_s22, %s611_s7  ;;  %s616_s11 = sshll.u32 %s699_s10, 4  ;;  %s617_s11 = int_to_ptr.vmem [resolvable:$false] %s616_s11 }
  0x34   : > { %s618_s21 = scalar_lea.vmem %s617_s11, 256  ;;  %p619_p2 = scmp.lt.s32.totalorder %s818_s22, %s617_s11 }
  0x35   : > { %p614_p6 = pnand %p612_p1, %p600_p7  ;;  %p620_p3 = scmp.lt.s32.totalorder %s618_s21, %s611_s7 }
  0x37   : > { %p615_p5 = pneg %p614_p6  ;;  %p621_p4 = por %p620_p3, %p619_p2 }
  0x39   : > { %p622_p8 = pnand %p621_p4, %p615_p5 }
  0x3b   : > { %625 = shalt.err (!%p622_p8)
}
  0x3c   : > { %515 = dma.hbm_to_vmem [thread:$0]  (!%p814_p11), %s812_s17, 128, %s818_s22, %s820_s25, %s697_s28, %s697_s28, %s698_s29  }
  0x3d   : > { %p933_p1 = scmp.ne.s32.totalorder %s928_s20, 0 }
  0x3e   : > { %s847_s26 = sand.u32 (!%p933_p1), 1, %s686_s13   ;;  %p934_p4 = scmp.ne.s32.totalorder (!%p933_p1), %s926_s18, 0 }
  0x3f   : > { %171 = sbr.rel (%p933_p1) target bundleno = 320 (0x140), region = 32  ;;  %s442_s27 = sshll.u32 (!%p933_p1), %s847_s26, 3 }
  0x40   : > { %s174_s30 = scalar_lea.sflag (!%p933_p1), [#allocation3], %s847_s26  ;;  %s853_s23 = scalar_lea.vmem (!%p933_p1), [#allocation2], %s442_s27 }
  0x44   : > { %669 = dma.done.wait (%p934_p4), %s174_s30, 128  }
  0x45   : > { %671 = vsyncadd (%p934_p4), %s174_s30, 4294967168  ;;  %p935_p6 = scmp.eq.s32.totalorder %s746_s16, 0 }
  0x47   : > { %673 = dma.done.wait (%p935_p6), [#allocation6], 1024   ;;  %p936_p8 = pmov %p935_p6 }
  0x48   : > { %v700_v0 = vmov 0.0   ;;  %vm701_vm0 = vmmov 0   ;;  %v563_v1 = vld [vmem:[#allocation5 + $0x38] sm:$0xff]   ;;  %v564_v2 = vld [vmem:[#allocation5 + $0x30] sm:$0xff]   ;;  %v565_v3 = vld [vmem:[#allocation5 + $0x28] sm:$0xff]   ;;  %s203_s28 = scalar_lea.vmem [#allocation7], %s442_s27 }
  0x49   : > { %675 = vsyncadd (%p936_p8), [#allocation6], 4294966272  ;;  %480 = vmatprep.subr.bf16.mxu0 %v700_v0  ;;  %496 = vmatprep.mubr.msk.bf16.mxu0 %vm701_vm0, %v700_v0  ;;  %v566_v4 = vld [vmem:[#allocation5 + $0x20] sm:$0xff]   ;;  %v567_v5 = vld [vmem:[#allocation5 + $0x18] sm:$0xff]   ;;  %s351_s29 = sshll.u32 %s203_s28, 4  ;;  %s465_s17 = sshll.u32 %s746_s16, 7  ;;  %s870_s29 = int_to_ptr.vmem [resolvable:$true] %s351_s29 }
  0x4a   : > { %481 = vmatpush3.bf16.msra.mxu0 %v563_v1  ;;  %v568_v6 = vld [vmem:[#allocation5 + $0x10] sm:$0xff]   ;;  %v569_v7 = vld [vmem:[#allocation5 + $0x8] sm:$0xff]   ;;  %v570_v8 = vld [vmem:[#allocation5] sm:$0xff]   ;;  %s875_s4 = scalar_lea.hbm %s921_s3, %s465_s17  ;;  %s338_s8 = scalar_lea.sflag [#allocation4], %s847_s26 }
  0x4b   : > { %482 = vmatprep.subr.bf16.mxu0 %v700_v0  ;;  %v571_v9 = vld [vmem:[%s853_s23] sm:$0xff]   ;;  %s626_s9 = scalar_lea.vmem %s870_s29, 128  ;;  %p937_p11 = scmp.ne.s32.totalorder %s931_s6, 0 }
  0x4c   : > { %v445_v11 = vld [vmem:[%s920_s2] ss:$0 sm:$0xff]  ;;  %p627_p3 = scmp.ne.s32.totalorder %s870_s29, %s626_s9  ;;  %s702_s16 = smov [#allocation7]  }
  0x4d   : > { %s630_s7 = sshll.u32 %s702_s16, 4  ;;  %s631_s7 = int_to_ptr.vmem [resolvable:$false] %s630_s7 }
  0x4e   : > { %483 = vmatpush3.bf16.msra.mxu0 %v564_v2  ;;  %p628_p7 = pnand %p627_p3, %p937_p11  ;;  %s632_s10 = scalar_lea.vmem %s631_s7, 256 }
  0x4f   : > { %484 = vmatprep.subr.bf16.mxu0 %v700_v0  ;;  %p633_p10 = scmp.lt.s32.totalorder %s870_s29, %s631_s7  ;;  %p634_p12 = scmp.lt.s32.totalorder %s632_s10, %s626_s9 }
  0x50   : > { %p629_p9 = pneg %p628_p7 }
  0x51   : > { %p635_p13 = por %p634_p12, %p633_p10 }
  0x52   : > { %485 = vmatpush3.bf16.msra.mxu0 %v565_v3 }
  0x53   : > { %486 = vmatprep.subr.bf16.mxu0 %v700_v0  ;;  %p636_p0 = pnand %p635_p13, %p629_p9 }
  0x56   : > { %487 = vmatpush3.bf16.msra.mxu0 %v566_v4 }
  0x57   : > { %488 = vmatprep.subr.bf16.mxu0 %v700_v0 }
  0x5a   : > { %489 = vmatpush3.bf16.msra.mxu0 %v567_v5 }
  0x5b   : > { %490 = vmatprep.subr.bf16.mxu0 %v700_v0 }
  0x5e   : > { %491 = vmatpush3.bf16.msra.mxu0 %v568_v6 }
  0x5f   : > { %492 = vmatprep.subr.bf16.mxu0 %v700_v0 }
  0x62   : > { %493 = vmatpush3.bf16.msra.mxu0 %v569_v7 }
  0x63   : > { %494 = vmatprep.subr.bf16.mxu0 %v700_v0 }
  0x66   : > { %495 = vmatpush3.bf16.msra.mxu0 %v570_v8 }
  0x69   : > { %497 = vmatmul.mubr.bf16.vlgmr.msra.gmra.mxu0 %v571_v9 }
 0x129   : > { %v320_v10 = vpop.f32.mrf.mxu0 }
 0x12a   : > { %v321_v14 = vadd.f32 %v445_v11, %v320_v10 }
 0x12b   : > { %v498_v12 = vpop.f32.mrf.mxu0 }
 0x12d   : > { %v323_v13 = vpop.f32.mrf.mxu0 }
 0x12e   : > { %v324_v15 = vadd.f32 %v445_v11, %v323_v13 }
 0x12f   : > { %v499_v16 = vpop.f32.mrf.mxu0 }
 0x130   : > { %v469_v17 = vpack.c.bf16 %v324_v15, %v321_v14 }
 0x132   : > { %470 = vst [vmem:[%s203_s28] sm:$0xff] %v469_v17  }
 0x133   : > { %639 = shalt.err (!%p636_p0)
}
 0x134   : > { %s640_s11 = scalar_lea.hbm %s875_s4, 128  ;;  %s644_s30 = scalar_lea.hbm %s921_s3, 256 }
 0x135   : > { %p641_p5 = scmp.ne.s32.totalorder %s875_s4, %s640_s11  ;;  %p645_p4 = scmp.lt.s32.totalorder %s875_s4, %s921_s3 }
 0x136   : > { %p646_p6 = scmp.lt.s32.totalorder %s644_s30, %s640_s11 }
 0x137   : > { %p642_p2 = pnand %p641_p5, %p937_p11 }
 0x138   : > { %p647_p8 = por %p646_p6, %p645_p4 }
 0x139   : > { %p643_p1 = pneg %p642_p2 }
 0x13b   : > { %p648_p3 = pnand %p647_p8, %p643_p1 }
 0x13d   : > { %651 = shalt.err (!%p648_p3)
}
 0x13e   : > { %s703_s20 = smov 64   ;;  %s704_s28 = smov 4  }
 0x13f   : > { %506 = dma.vmem_to_hbm [thread:$0]  (%p937_p11), %s870_s29, 128, %s875_s4, %s338_s8, %s703_s20, %s703_s20, %s704_s28  }
 0x140 PF: > { %s366_s17 = sand.u32 1, %s682_s12   ;;  %p938_p7 = scmp.ne.s32.totalorder %s927_s19, 0 }
 0x141   : > { %p939_p9 = scmp.ge.s32.totalorder %s694_s15, 2  ;;  %s367_s22 = scalar_lea.sflag [#allocation4], %s366_s17 }
 0x143   : > { %p517_p10 = pnand %p939_p9, %p938_p7 }
 0x145   : > { %p518_p12 = pneg %p517_p10 }
 0x147   : > { %677 = dma.done.wait (%p518_p12), %s367_s22, 128  }
 0x148   : > { %679 = vsyncadd (%p518_p12), %s367_s22, 4294967168  ;;  %p17_p13 = scmp.ge.s32.totalorder %s779_s24, 4   ;;  %s940_s12 = smov %s686_s13 }
 0x149   : > { %s941_s13 = smov %s690_s14  ;;  %s942_s14 = smov %s799_s5 }
 0x14a   : > { %s943_s15 = smov %s779_s24  ;;  %19 = sbr.rel (!%p17_p13) target bundleno = 6 (0x6), region = 81 }
 0x14f   :  { %372 = vsyncpa [#allocation3], 1 }
 0x150   :  { %374 = vsyncpa [#allocation3 + $0x1], 1 }
 0x151   :  { %375 = vsyncpa [#allocation6], 1 }
 0x152   :  { %376 = vsyncpa [#allocation4], 1 }
 0x153   :  { %378 = vsyncpa [#allocation4 + $0x1], 1 }

// kernel: tpu_custom_call.1
= control target key start
LH: loop header
LB: loop body
LE: loop exit
PB: predicated region body
PF: predicated region fallthrough
CT: control target
= control target key end

     0   :  { %8 = vsyncpa [#allocation3], 0  ;;  %s918_s0 = inlined_call_operand.hbm [shape: bf16[32,128], index: 0, kind: input, shape index: {}]   ;;  %s919_s1 = inlined_call_operand.hbm [shape: bf16[128,128], index: 1, kind: input, shape index: {}]   ;;  %s920_s2 = inlined_call_operand.vmem [shape: f32[1,128], index: 2, kind: input, shape index: {}]   ;;  %s921_s3 = inlined_call_operand.hbm [shape: bf16[32,128], index: 3, kind: output, shape index: {}]  }
   0x1   :  { %10 = vsyncpa [#allocation3 + $0x1], 0 }
   0x2   :  { %11 = vsyncpa [#allocation6], 0 }
   0x3   :  { %12 = vsyncpa [#allocation4], 0 }
   0x4   :  { %14 = vsyncpa [#allocation4 + $0x1], 0  ;;  %s725_s12 = smov 0   ;;  %s727_s13 = smov 0  }
   0x5   :  { %s729_s14 = smov 0   ;;  %s731_s15 = smov 0  }
   0x6 LB: > { %s746_s16 = sadd.s32 4294967295, %s694_s15   ;;  %s434_s17 = sadd.s32 4294967294, %s694_s15   ;;  %s694_s15 = sphi %s731_s15, %s943_s15   ;;  %s690_s14 = sphi %s729_s14, %s942_s14   ;;  %s686_s13 = sphi %s727_s13, %s941_s13   ;;  %s682_s12 = sphi %s725_s12, %s940_s12  }
   0x7   : > { %p40_p0 = scmp.ne.s32.totalorder %s686_s13, %s682_s12  ;;  %p922_p1 = scmp.eq.s32.totalorder %s746_s16, 0 }
   0x8   : > { %p112_p3 = scmp.eq.s32.totalorder %s434_s17, 1  ;;  %p435_p5 = scmp.ge.s32.totalorder %s694_s15, 1 }
   0x9   : > { %p755_p4 = por %p922_p1, %p40_p0  ;;  %p119_p7 = scmp.lt.s32.totalorder %s694_s15, 3 }
   0xa   : > { %p760_p6 = por %p112_p3, %p40_p0  ;;  %s696_s21 = smov [#allocation5]  }
   0xb   : > { %s926_s18 = scalar_select %p755_p4, 1, 0 }
   0xc   : > { %s927_s19 = scalar_select %p760_p6, 1, 0 }
   0xd   : > { %p765_p8 = pnand %p435_p5, %p119_p7  ;;  %s131_s22 = sshll.u32 %s696_s21, 4  ;;  %s132_s22 = int_to_ptr.vmem [resolvable:$true] %s131_s22 }
   0xe   : > { %s779_s24 = sadd.s32 1, %s694_s15   ;;  %s27_s25 = sadd.s32 1, %s690_s14 }
   0xf   : > { %s928_s20 = scalar_select %p765_p8, 1, 0 }
  0x10   : > { %p508_p9 = pneg %p765_p8  ;;  %s24_s26 = ssub.s32 %s694_s15, %s779_s24 }
  0x11   : > { %s583_s27 = scalar_lea.vmem %s132_s22, 1024  ;;  %p591_p5 = scmp.lt.s32.totalorder %s132_s22, %s132_s22 }
  0x12   : > { %p774_p11 = pnand %p508_p9, %p922_p1  ;;  %p584_p13 = scmp.ne.s32.totalorder %s132_s22, %s583_s27 }
  0x13   : > { %p592_p7 = scmp.lt.s32.totalorder %s583_s27, %s583_s27 }
  0x14   : > { %p574_p12 = pneg %p774_p11 }
  0x15   : > { %p593_p10 = por %p592_p7, %p591_p5 }
  0x16   : > { %p586_p0 = pnand %p584_p13, %p574_p12 }
  0x18   : > { %p587_p3 = pneg %p586_p0 }
  0x1a   : > { %p594_p2 = pnand %p593_p10, %p587_p3 }
  0x1c   : > { %597 = shalt.err (!%p594_p2)
}
  0x1d   : > { %s697_s28 = smov 64   ;;  %s698_s29 = smov 4  }
  0x1e   : > { %511 = dma.hbm_to_vmem [thread:$0]  (!%p774_p11), %s919_s1, 1024, %s132_s22, [#allocation6], %s697_s28, %s697_s28, %s698_s29  }
  0x1f   : > { %p25_p2 = scmp.eq.s32.totalorder %s24_s26, 0  ;;  %p34_p9 = scmp.ne.s32.totalorder %s690_s14, %s686_s13 }
  0x20   : > { %p35_p10 = scmp.eq.s32.totalorder %s694_s15, 0  ;;  %p521_p12 = scmp.lt.s32.totalorder %s694_s15, 2 }
  0x21   : > { %s799_s5 = scalar_select %p25_p2, %s690_s14, %s27_s25  }
  0x22   : > { %p36_p13 = por %p35_p10, %p34_p9  ;;  %p930_p0 = scmp.eq.s32.totalorder %s746_s16, 1 }
  0x23   : > { %s148_s7 = sand.u32 1, %s690_s14   ;;  %s462_s8 = sshll.u32 %s694_s15, 7 }
  0x24   : > { %p803_p3 = por %p930_p0, %p34_p9  ;;  %s438_s9 = sshll.u32 %s148_s7, 3 }
  0x25   : > { %s812_s17 = scalar_lea.hbm %s918_s0, %s462_s8  ;;  %s152_s21 = scalar_lea.vmem [#allocation2], %s438_s9 }
  0x26   : > { %s931_s6 = scalar_select %p803_p3, 1, 0 }
  0x27   : > { %s159_s22 = sshll.u32 %s152_s21, 4  ;;  %p814_p11 = pnand %p521_p12, %p36_p13  ;;  %s818_s22 = int_to_ptr.vmem [resolvable:$true] %s159_s22 }
  0x28   : > { %s820_s25 = scalar_lea.sflag [#allocation3], %s148_s7  ;;  %s598_s26 = scalar_lea.hbm %s812_s17, 128 }
  0x29   : > { %p599_p5 = scmp.ne.s32.totalorder %s812_s17, %s598_s26  ;;  %p600_p7 = pneg %p814_p11 }
  0x2a   : > { %s603_s4 = scalar_lea.hbm %s918_s0, 256  ;;  %p604_p10 = scmp.lt.s32.totalorder %s812_s17, %s918_s0 }
  0x2b   : > { %p601_p2 = pnand %p600_p7, %p599_p5  ;;  %p605_p12 = scmp.lt.s32.totalorder %s603_s4, %s598_s26 }
  0x2d   : > { %p602_p9 = pneg %p601_p2  ;;  %p606_p13 = por %p605_p12, %p604_p10 }
  0x2f   : > { %p607_p0 = pnand %p606_p13, %p602_p9 }
  0x31   : > { %610 = shalt.err (!%p607_p0)
}
  0x32   : > { %s611_s7 = scalar_lea.vmem %s818_s22, 128  ;;  %s699_s10 = smov [#allocation2]  }
  0x33   : > { %p612_p1 = scmp.ne.s32.totalorder %s818_s22, %s611_s7  ;;  %s616_s11 = sshll.u32 %s699_s10, 4  ;;  %s617_s11 = int_to_ptr.vmem [resolvable:$false] %s616_s11 }
  0x34   : > { %s618_s21 = scalar_lea.vmem %s617_s11, 256  ;;  %p619_p2 = scmp.lt.s32.totalorder %s818_s22, %s617_s11 }
  0x35   : > { %p614_p6 = pnand %p612_p1, %p600_p7  ;;  %p620_p3 = scmp.lt.s32.totalorder %s618_s21, %s611_s7 }
  0x37   : > { %p615_p5 = pneg %p614_p6  ;;  %p621_p4 = por %p620_p3, %p619_p2 }
  0x39   : > { %p622_p8 = pnand %p621_p4, %p615_p5 }
  0x3b   : > { %625 = shalt.err (!%p622_p8)
}
  0x3c   : > { %515 = dma.hbm_to_vmem [thread:$0]  (!%p814_p11), %s812_s17, 128, %s818_s22, %s820_s25, %s697_s28, %s697_s28, %s698_s29  }
  0x3d   : > { %p933_p1 = scmp.ne.s32.totalorder %s928_s20, 0 }
  0x3e   : > { %s847_s26 = sand.u32 (!%p933_p1), 1, %s686_s13   ;;  %p934_p4 = scmp.ne.s32.totalorder (!%p933_p1), %s926_s18, 0 }
  0x3f   : > { %171 = sbr.rel (%p933_p1) target bundleno = 320 (0x140), region = 32  ;;  %s442_s27 = sshll.u32 (!%p933_p1), %s847_s26, 3 }
  0x40   : > { %s174_s30 = scalar_lea.sflag (!%p933_p1), [#allocation3], %s847_s26  ;;  %s853_s23 = scalar_lea.vmem (!%p933_p1), [#allocation2], %s442_s27 }
  0x44   : > { %669 = dma.done.wait (%p934_p4), %s174_s30, 128  }
  0x45   : > { %671 = vsyncadd (%p934_p4), %s174_s30, 4294967168  ;;  %p935_p6 = scmp.eq.s32.totalorder %s746_s16, 0 }
  0x47   : > { %673 = dma.done.wait (%p935_p6), [#allocation6], 1024   ;;  %p936_p8 = pmov %p935_p6 }
  0x48   : > { %v700_v0 = vmov 0.0   ;;  %vm701_vm0 = vmmov 0   ;;  %v563_v1 = vld [vmem:[#allocation5 + $0x38] sm:$0xff]   ;;  %v564_v2 = vld [vmem:[#allocation5 + $0x30] sm:$0xff]   ;;  %v565_v3 = vld [vmem:[#allocation5 + $0x28] sm:$0xff]   ;;  %s203_s28 = scalar_lea.vmem [#allocation7], %s442_s27 }
  0x49   : > { %675 = vsyncadd (%p936_p8), [#allocation6], 4294966272  ;;  %480 = vmatprep.subr.bf16.mxu0 %v700_v0  ;;  %496 = vmatprep.mubr.msk.bf16.mxu0 %vm701_vm0, %v700_v0  ;;  %v566_v4 = vld [vmem:[#allocation5 + $0x20] sm:$0xff]   ;;  %v567_v5 = vld [vmem:[#allocation5 + $0x18] sm:$0xff]   ;;  %s351_s29 = sshll.u32 %s203_s28, 4  ;;  %s465_s17 = sshll.u32 %s746_s16, 7  ;;  %s870_s29 = int_to_ptr.vmem [resolvable:$true] %s351_s29 }
  0x4a   : > { %481 = vmatpush3.bf16.msra.mxu0 %v563_v1  ;;  %v568_v6 = vld [vmem:[#allocation5 + $0x10] sm:$0xff]   ;;  %v569_v7 = vld [vmem:[#allocation5 + $0x8] sm:$0xff]   ;;  %v570_v8 = vld [vmem:[#allocation5] sm:$0xff]   ;;  %s875_s4 = scalar_lea.hbm %s921_s3, %s465_s17  ;;  %s338_s8 = scalar_lea.sflag [#allocation4], %s847_s26 }
  0x4b   : > { %482 = vmatprep.subr.bf16.mxu0 %v700_v0  ;;  %v571_v9 = vld [vmem:[%s853_s23] sm:$0xff]   ;;  %s626_s9 = scalar_lea.vmem %s870_s29, 128  ;;  %p937_p11 = scmp.ne.s32.totalorder %s931_s6, 0 }
  0x4c   : > { %v445_v11 = vld [vmem:[%s920_s2] ss:$0 sm:$0xff]  ;;  %p627_p3 = scmp.ne.s32.totalorder %s870_s29, %s626_s9  ;;  %s702_s16 = smov [#allocation7]  }
  0x4d   : > { %s630_s7 = sshll.u32 %s702_s16, 4  ;;  %s631_s7 = int_to_ptr.vmem [resolvable:$false] %s630_s7 }
  0x4e   : > { %483 = vmatpush3.bf16.msra.mxu0 %v564_v2  ;;  %p628_p7 = pnand %p627_p3, %p937_p11  ;;  %s632_s10 = scalar_lea.vmem %s631_s7, 256 }
  0x4f   : > { %484 = vmatprep.subr.bf16.mxu0 %v700_v0  ;;  %p633_p10 = scmp.lt.s32.totalorder %s870_s29, %s631_s7  ;;  %p634_p12 = scmp.lt.s32.totalorder %s632_s10, %s626_s9 }
  0x50   : > { %p629_p9 = pneg %p628_p7 }
  0x51   : > { %p635_p13 = por %p634_p12, %p633_p10 }
  0x52   : > { %485 = vmatpush3.bf16.msra.mxu0 %v565_v3 }
  0x53   : > { %486 = vmatprep.subr.bf16.mxu0 %v700_v0  ;;  %p636_p0 = pnand %p635_p13, %p629_p9 }
  0x56   : > { %487 = vmatpush3.bf16.msra.mxu0 %v566_v4 }
  0x57   : > { %488 = vmatprep.subr.bf16.mxu0 %v700_v0 }
  0x5a   : > { %489 = vmatpush3.bf16.msra.mxu0 %v567_v5 }
  0x5b   : > { %490 = vmatprep.subr.bf16.mxu0 %v700_v0 }
  0x5e   : > { %491 = vmatpush3.bf16.msra.mxu0 %v568_v6 }
  0x5f   : > { %492 = vmatprep.subr.bf16.mxu0 %v700_v0 }
  0x62   : > { %493 = vmatpush3.bf16.msra.mxu0 %v569_v7 }
  0x63   : > { %494 = vmatprep.subr.bf16.mxu0 %v700_v0 }
  0x66   : > { %495 = vmatpush3.bf16.msra.mxu0 %v570_v8 }
  0x69   : > { %497 = vmatmul.mubr.bf16.vlgmr.msra.gmra.mxu0 %v571_v9 }
 0x129   : > { %v320_v10 = vpop.f32.mrf.mxu0 }
 0x12a   : > { %v321_v14 = vadd.f32 %v445_v11, %v320_v10 }
 0x12b   : > { %v498_v12 = vpop.f32.mrf.mxu0 }
 0x12d   : > { %v323_v13 = vpop.f32.mrf.mxu0 }
 0x12e   : > { %v324_v15 = vadd.f32 %v445_v11, %v323_v13 }
 0x12f   : > { %v499_v16 = vpop.f32.mrf.mxu0 }
 0x130   : > { %v469_v17 = vpack.c.bf16 %v324_v15, %v321_v14 }
 0x132   : > { %470 = vst [vmem:[%s203_s28] sm:$0xff] %v469_v17  }
 0x133   : > { %639 = shalt.err (!%p636_p0)
}
 0x134   : > { %s640_s11 = scalar_lea.hbm %s875_s4, 128  ;;  %s644_s30 = scalar_lea.hbm %s921_s3, 256 }
 0x135   : > { %p641_p5 = scmp.ne.s32.totalorder %s875_s4, %s640_s11  ;;  %p645_p4 = scmp.lt.s32.totalorder %s875_s4, %s921_s3 }
 0x136   : > { %p646_p6 = scmp.lt.s32.totalorder %s644_s30, %s640_s11 }
 0x137   : > { %p642_p2 = pnand %p641_p5, %p937_p11 }
 0x138   : > { %p647_p8 = por %p646_p6, %p645_p4 }
 0x139   : > { %p643_p1 = pneg %p642_p2 }
 0x13b   : > { %p648_p3 = pnand %p647_p8, %p643_p1 }
 0x13d   : > { %651 = shalt.err (!%p648_p3)
}
 0x13e   : > { %s703_s20 = smov 64   ;;  %s704_s28 = smov 4  }
 0x13f   : > { %506 = dma.vmem_to_hbm [thread:$0]  (%p937_p11), %s870_s29, 128, %s875_s4, %s338_s8, %s703_s20, %s703_s20, %s704_s28  }
 0x140 PF: > { %s366_s17 = sand.u32 1, %s682_s12   ;;  %p938_p7 = scmp.ne.s32.totalorder %s927_s19, 0 }
 0x141   : > { %p939_p9 = scmp.ge.s32.totalorder %s694_s15, 2  ;;  %s367_s22 = scalar_lea.sflag [#allocation4], %s366_s17 }
 0x143   : > { %p517_p10 = pnand %p939_p9, %p938_p7 }
 0x145   : > { %p518_p12 = pneg %p517_p10 }
 0x147   : > { %677 = dma.done.wait (%p518_p12), %s367_s22, 128  }
 0x148   : > { %679 = vsyncadd (%p518_p12), %s367_s22, 4294967168  ;;  %p17_p13 = scmp.ge.s32.totalorder %s779_s24, 4   ;;  %s940_s12 = smov %s686_s13 }
 0x149   : > { %s941_s13 = smov %s690_s14  ;;  %s942_s14 = smov %s799_s5 }
 0x14a   : > { %s943_s15 = smov %s779_s24  ;;  %19 = sbr.rel (!%p17_p13) target bundleno = 6 (0x6), region = 81 }
 0x14f   :  { %372 = vsyncpa [#allocation3], 1 }
 0x150   :  { %374 = vsyncpa [#allocation3 + $0x1], 1 }
 0x151   :  { %375 = vsyncpa [#allocation6], 1 }
 0x152   :  { %376 = vsyncpa [#allocation4], 1 }
 0x153   :  { %378 = vsyncpa [#allocation4 + $0x1], 1 }

</bundles_post_ra>
